<compile_context>
chip_gen: v7x
topology: tpu7x:2x2x1
jax: 0.10.0
libtpu: 0.0.40
codegen_flags: <defaults>
</compile_context>

<pallas_src>
import jax
import jax.numpy as jnp
from jax.experimental import pallas as pl
from jax.experimental.pallas import tpu as pltpu

CONSTANT_SRF = (-0.40107638, 0.95721835, 0.21377654, 0.16151386)


# --------------------------- hardware-aware budgets ----------------------------
def _vmem_capacity_bytes():
    """Physical VMEM per TensorCore, generation-aware, with safe fallbacks."""
    try:
        cap = int(getattr(pltpu.get_tpu_info(), "vmem_capacity_bytes", 0))
        if cap > 0:
            return cap
    except Exception:
        pass
    kind = ""
    try:
        kind = (jax.devices()[0].device_kind or "").lower()
    except Exception:
        pass
    if "v7" in kind:
        return 64 << 20           # v7x: 64 MiB per TensorCore
    if "v2" in kind or "v3" in kind:
        return 16 << 20
    return 128 << 20              # v4 / v5e / v6e


def _memory_profile():
    """Returns (vmem_capacity, input_tile_budget).

    The budget bounds the multi-buffered input working set: ~35% of physical VMEM,
    capped at 48 MiB — so v5e/v6e get ~45 MiB, v7x ~22 MiB — always leaving ample
    scoped-VMEM headroom for the accumulator and Mosaic internals.
    """
    cap = _vmem_capacity_bytes()
    return cap, min(int(0.35 * cap), 48 << 20)


# ------------------------------ tiling selection --------------------------------
def _choose_lanes(n_spatial, width):
    """Lane width L for the free (B, 5, R, L) view of each (B, 5, H, W) volume.

    Picks a divisor of N = H*W that is a multiple of 128 (full vreg lane density),
    preferring factorizations where R = N/L is a multiple of 8 with an even number of
    8-row groups (enables the 2-way core split) and enough groups for pipelining.
    """
    cands = [L for L in range(128, min(n_spatial, 8192) + 1, 128) if n_spatial % L == 0]
    if not cands:
        # No 128-multiple divisor of N: keep the native row layout.  A full-extent
        # lane block (== W) is legal; vregs are lane-masked.
        # TODO(synk): could pad W to a multiple of 128 instead, at the cost of a
        #             wrapper-side copy.
        return width

    def score(L):
        R = n_spatial // L
        r8_ok = (R % 8 == 0)
        rows8 = R // 8 if r8_ok else 0
        return (
            r8_ok,                              # clean (8, .) sublane tiles
            rows8 > 0 and rows8 % 2 == 0,       # even #row-groups -> 2-way core split
            min(rows8, 32),                     # enough groups for pipelining
            128 <= L <= 1024,                   # moderate lane width
            L,                                  # then widest lanes (big contiguous DMA)
        )

    return max(cands, key=score)


def _choose_tiling(R, cap_rows, want_parallel=2, min_steps_per_core=4):
    """Returns (tm, G, P) with R % tm == 0, tm % 8 == 0 or tm == R, G = R // tm,
    G % P == 0.

    Preference order: 2-way core split (P=2) whenever the factorization admits an even
    G (neutral on single-core chips, up to ~2x on dual-core chips); >= ~4 inner steps
    per core for double-buffered DMA/compute overlap; then the largest tile that fits
    the VMEM budget (bigger contiguous DMA chunks, fewer per-step overheads).
    """
    if R % 8 != 0 or R <= 8:
        return R, 1, 1                               # full-extent block (legal), tiny input
    rows8 = R // 8
    cap8 = max(1, cap_rows // 8)
    divs = [d for d in range(1, rows8 + 1) if rows8 % d == 0]
    for P in (want_parallel, 1):
        cands = [t for t in divs if t <= cap8 and (rows8 // t) % P == 0]
        if not cands:
            continue                                 # rows8 odd -> no even-G split

        def key(t):
            g_in = (rows8 // t) // P
            return (min(g_in, min_steps_per_core), t)

        t = max(cands, key=key)
        return 8 * t, rows8 // t, P
    return 8, rows8, 1                               # unreachable (t=1 always valid for P=1)


# ------------------------------- Pallas kernel ----------------------------------
def _make_sure_kernel(weights, gain, tau, n_elems, n_chan, tm, sub, lanes):
    """Builds the SURE-Poisson structural loss kernel.

    Refs (in order): pan(y), pan(b), s1[0..Cw-1], s2[0..Cw-1], out, acc.
    Each input block is (B, 1, tm, lanes) in its native dtype (cast to f32 in-kernel).
    Per inner ("arbitrary") grid step it folds the three per-tile terms down to a
    (sub, lanes) f32 slab with pure VPU adds and accumulates with a single RMW:
      acc[0] = sum((pan1 - pan)^2)
      acc[1] = sum(pan)
      acc[2] = sum(b * pan * (pan2 - pan1))
    On the last inner step of each leading ("parallel") grid index p it finalizes a
    partial loss:
      out[p] = (acc[0] - gain*acc[1] + (2/tau)*gain*acc[2]) / n
    The wrapper sums the partials over p.
    """
    weights = tuple(float(w) for w in weights)
    gain = float(gain)
    tau = float(tau)
    inv_n = 1.0 / float(n_elems)

    def fold(t):  # (B, 1, tm, lanes) f32 -> (sub, lanes) f32, pure VPU adds
        t = jnp.sum(t, axis=(0, 1))                          # (tm, lanes)
        if tm != sub:
            t = jnp.sum(t.reshape(tm // sub, sub, lanes), axis=0)
        return t

    def kernel(*refs):
        pan_ref, b_ref = refs[0], refs[1]
        s1_refs = refs[2:2 + n_chan]
        s2_refs = refs[2 + n_chan:2 + 2 * n_chan]
        out_ref = refs[2 + 2 * n_chan]
        acc_ref = refs[3 + 2 * n_chan]

        i = pl.program_id(1)

        @pl.when(i == 0)
        def _():
            acc_ref[...] = jnp.zeros_like(acc_ref)

        pan = pan_ref[...].astype(jnp.float32)               # (B, 1, tm, lanes)
        bp = b_ref[...].astype(jnp.float32)

        # pan reconstruction = SRF-weighted sum over the selected source channels.
        pan1 = weights[0] * s1_refs[0][...].astype(jnp.float32)
        pan2 = weights[0] * s2_refs[0][...].astype(jnp.float32)
        for c in range(1, n_chan):
            pan1 = pan1 + weights[c] * s1_refs[c][...].astype(jnp.float32)
            pan2 = pan2 + weights[c] * s2_refs[c][...].astype(jnp.float32)

        diff = pan1 - pan
        # Single accumulator read-modify-write per step (1 load + 1 store of (3,sub,L)).
        terms = jnp.stack(
            [fold(diff * diff), fold(pan), fold(bp * pan * (pan2 - pan1))], axis=0)
        acc_ref[...] += terms

        @pl.when(i == pl.num_programs(1) - 1)
        def _():
            s0 = jnp.sum(acc_ref[0], keepdims=True)          # (1, 1)
            s1 = jnp.sum(acc_ref[1], keepdims=True)
            s2 = jnp.sum(acc_ref[2], keepdims=True)
            out_ref[0] = (s0 - gain * s1 + (2.0 / tau) * gain * s2) * inv_n

    return kernel


# ---------------------------------- wrapper --------------------------------------
def sure_poisson_structural_loss(y, x_net, x_net2, b, *, gain, tau=1e-3,
                                 srf_from="estimate"):
    """SurePoissonStructuralLoss given
       y      : noisy volume              (B, 5, H, W)
       x_net  : model(y)                  (B, 5, H, W)
       x_net2 : model(y + tau*b)          (B, 5, H, W)
       b      : Rademacher perturbation   (B, 5, H, W)
    Inputs may be float32 or bfloat16; no wrapper-side copies or casts are made.
    (Note: with bfloat16 x_net/x_net2 and small tau, the divergence term is dominated
    by input quantization noise — keep the network outputs in f32 for meaningful SURE
    estimates.)
    """
    assert srf_from in ("estimate", "average", "constant")
    B, C, H, W = y.shape
    assert C == 5, "volume layout: 1 pan channel + 4 HRMS channels"
    assert x_net.shape == y.shape and x_net2.shape == y.shape and b.shape == y.shape

    if srf_from == "estimate":
        weights, chan_off = (1.0,), 0            # pan_from_volume(x_net)
    elif srf_from == "average":
        weights, chan_off = (0.25,) * 4, 1       # mean over HRMS channels 1..4
    else:  # "constant"
        weights, chan_off = CONSTANT_SRF, 1      # SRF-weighted HRMS channels 1..4
    Cw = len(weights)

    # Free (layout-preserving) reshape of every volume to a lane-dense (B, 5, R, L)
    # view.  No transpose, no channel slice, no dtype cast.
    N = H * W
    L = _choose_lanes(N, W)
    R = N // L
    yv, bv, x1v, x2v = (v.reshape(B, C, R, L) for v in (y, b, x_net, x_net2))

    e_bytes = max(jnp.dtype(v.dtype).itemsize for v in (y, b, x_net, x_net2))
    streams = 2 + 2 * Cw                         # pan, b, Cw x s1, Cw x s2

    vmem_cap, tile_budget = _memory_profile()
    row_bytes = 2 * streams * B * L * e_bytes    # double-buffered input bytes per row
    cap_rows = max(8, tile_budget // row_bytes)

    tm, G, P = _choose_tiling(R, cap_rows)
    assert R % tm == 0 and G % P == 0, (R, tm, G, P)
    G_in = G // P
    sub = 8 if tm % 8 == 0 else tm               # folded accumulator sublane height
    n_elems = B * N                              # mean over the (B, 1, H, W) pan tensor

    # Small tiles can't keep the DMA engine ahead with only double buffering: use
    # 3-deep buffering when blocks are small and there are enough steps to overlap.
    block_bytes = B * tm * L * e_bytes
    n_buf = 3 if (block_bytes < (256 << 10) and G_in >= 3) else 2

    kernel = _make_sure_kernel(weights, gain, tau, n_elems, Cw, tm, sub, L)

    def pan_map(p, i):                           # channel 0 of y / b
        return (0, 0, p * G_in + i, 0)

    def src_map(c):                              # channel chan_off + c of x_net / x_net2
        ch = chan_off + c

        def m(p, i):
            return (0, ch, p * G_in + i, 0)
        return m

    blk = (B, 1, tm, L)

    def make_in_spec(index_map):
        if n_buf == 2:
            return pl.BlockSpec(blk, index_map)
        return pl.BlockSpec(blk, index_map, pipeline_mode=pl.Buffered(n_buf))

    in_specs = ([make_in_spec(pan_map), make_in_spec(pan_map)]
                + [make_in_spec(src_map(c)) for c in range(Cw)]
                + [make_in_spec(src_map(c)) for c in range(Cw)])

    # Scoped-VMEM limit: actual need + margin, never above ~85% of physical VMEM
    # (v7x: 64 MiB/TC; v5e/v6e: 128 MiB).  The auto tile sizing above keeps the
    # working set well under this ceiling.
    vmem_need = n_buf * streams * B * tm * L * e_bytes + 3 * sub * L * 4 + (4 << 20)
    vmem_limit = int(min(max(32 << 20, vmem_need), int(0.85 * vmem_cap)))

    cost = pl.CostEstimate(
        flops=int((4 * Cw + 8) * B * N),
        transcendentals=0,
        bytes_accessed=int(streams * B * N * e_bytes + 4 * P))

    out = pl.pallas_call(
        kernel,
        out_shape=jax.ShapeDtypeStruct((P, 1, 1), jnp.float32),
        grid_spec=pltpu.PrefetchScalarGridSpec(
            num_scalar_prefetch=0,
            grid=(P, G_in),
            in_specs=in_specs,
            out_specs=pl.BlockSpec((1, 1, 1), lambda p, i: (p, 0, 0)),
            scratch_shapes=[pltpu.VMEM((3, sub, L), jnp.float32)]),
        compiler_params=pltpu.CompilerParams(
            dimension_semantics=("parallel", "arbitrary"),
            vmem_limit_bytes=vmem_limit),
        cost_estimate=cost,
    )(yv, bv, *([x1v] * Cw), *([x2v] * Cw))
    return jnp.sum(out)


# ----------------------------- pure-JAX reference ---------------------------------
def _hrms_of(v):
    return v[:, 1:5]


def _reference_loss(y, x_net, x_net2, b, *, gain, tau, srf_from):
    y, x_net, x_net2, b = (a.astype(jnp.float32) for a in (y, x_net, x_net2, b))

    def recon(v):
        if srf_from == "estimate":
            return v[:, 0:1]
        if srf_from == "average":
            return jnp.mean(_hrms_of(v), axis=1, keepdims=True)
        w = jnp.asarray(CONSTANT_SRF, jnp.float32).reshape(1, 4, 1, 1)
        return jnp.sum(_hrms_of(v) * w, axis=1, keepdims=True)

    pan = y[:, 0:1]
    pan1 = recon(x_net)
    pan2 = recon(x_net2)
    bp = b[:, 0:1]
    return (jnp.mean((pan1 - pan) ** 2)
            - gain * jnp.mean(pan)
            + 2.0 / tau * jnp.mean(bp * pan * gain * (pan2 - pan1)))


# ------------------------------------ demo ----------------------------------------
if __name__ == "__main__":
    gain, tau = 0.1, 1e-3
    master_key = jax.random.PRNGKey(0)

    def make_inputs(key, shape, dtype=jnp.float32):
        Bv, Cvol, Hv, Wv = shape
        k_y, k_w, k_b = jax.random.split(key, 3)
        y = jax.random.uniform(k_y, shape, jnp.float32)
        # deterministic synthetic "model": 1x1 channel-mixing conv (5 -> 5), near identity
        Wm = jnp.eye(Cvol, dtype=jnp.float32) + 0.1 * jax.random.normal(
            k_w, (Cvol, Cvol), jnp.float32)

        def model(v):
            return jnp.einsum("oc,bchw->bohw", Wm, v)

        # b = (2 * (rand > 0.5) - 1) * 1.0
        b = (jax.random.uniform(k_b, shape) > 0.5).astype(jnp.float32) * 2.0 - 1.0
        x_net = model(y)
        x_net2 = model(y + tau * b)
        return tuple(a.astype(dtype) for a in (y, x_net, x_net2, b))

    configs = [
        (2, 5, 16, 16),     # tiny: single full-extent tile, P=1
        (2, 5, 128, 128),   # L=128, tm=16, G=8 -> 2-way split, 4 steps/core, Buffered(3)
        (2, 5, 64, 128),    # L=128, tm=8,  G=8 -> 2-way split, 4 steps/core, Buffered(3)
        (1, 5, 24, 40),     # H*W not 128-divisible: native-W lane fallback, odd groups -> P=1
    ]
    keys = jax.random.split(master_key, len(configs) + 1)

    for cfg_i, shape in enumerate(configs):
        inputs = make_inputs(keys[cfg_i], shape)
        for mode in ("estimate", "average", "constant"):
            loss = sure_poisson_structural_loss(
                *inputs, gain=gain, tau=tau, srf_from=mode)
            loss = jax.block_until_ready(loss)
            ref = jax.block_until_ready(
                _reference_loss(*inputs, gain=gain, tau=tau, srf_from=mode))
            err = abs(float(loss) - float(ref))
            assert err < 1e-3 + 1e-3 * abs(float(ref)), (
                shape, mode, float(loss), float(ref))

    # bf16 inputs: tiles are DMA'd at half width and cast to f32 inside the kernel.
    inputs_bf16 = make_inputs(keys[-1], (2, 5, 64, 128), dtype=jnp.bfloat16)
    loss = jax.block_until_ready(sure_poisson_structural_loss(
        *inputs_bf16, gain=gain, tau=tau, srf_from="constant"))
    ref = jax.block_until_ready(
        _reference_loss(*inputs_bf16, gain=gain, tau=tau, srf_from="constant"))
    err = abs(float(loss) - float(ref))
    assert err < 1e-3 + 1e-3 * abs(float(ref)), ("bf16", float(loss), float(ref))

    print("KERNEL_OK")
</pallas_src>

<mosaic_0001>
module attributes {stable_mosaic.version = 11 : i64} {
  func.func @kernel(%arg0: i32, %arg1: i32, %arg2: memref<2x1x1x256xf32, #tpu.memory_space<vmem>>, %arg3: memref<2x1x1x256xf32, #tpu.memory_space<vmem>>, %arg4: memref<2x1x1x256xf32, #tpu.memory_space<vmem>>, %arg5: memref<2x1x1x256xf32, #tpu.memory_space<vmem>>, %arg6: memref<1x1x1xf32, #tpu.memory_space<vmem>>, %arg7: memref<3x1x256xf32, #tpu.memory_space<vmem>>) attributes {dimension_semantics = [#tpu.dimension_semantics<parallel>, #tpu.dimension_semantics<arbitrary>], iteration_bounds = array<i64: 1, 1>, scalar_prefetch = 0 : i64, scratch_operands = 1 : i64, tpu.core_type = #tpu.core_type<tc>, window_params = [{transform_indices = @transform_0, window_bounds = array<i64: 2, 1, 1, 256>}, {transform_indices = @transform_1, window_bounds = array<i64: 2, 1, 1, 256>}, {transform_indices = @transform_2, window_bounds = array<i64: 2, 1, 1, 256>}, {transform_indices = @transform_3, window_bounds = array<i64: 2, 1, 1, 256>}, {transform_indices = @transform_4, window_bounds = array<i64: 1, 1, 1>}]} {
    %c0_i32 = arith.constant 0 : i32
    %0 = arith.cmpi eq, %arg1, %c0_i32 : i32
    %1 = arith.extui %0 : i1 to i32
    %c0_i32_0 = arith.constant 0 : i32
    %2 = arith.cmpi ne, %1, %c0_i32_0 : i32
    scf.if %2 {
      %cst_28 = arith.constant 0.000000e+00 : f32
      %29 = vector.broadcast %cst_28 : f32 to vector<3x1x256xf32>
      %c0_29 = arith.constant 0 : index
      %c0_30 = arith.constant 0 : index
      %c0_31 = arith.constant 0 : index
      %30 = vector.load %arg7[%c0_29, %c0_30, %c0_31] : memref<3x1x256xf32, #tpu.memory_space<vmem>>, vector<3x1x256xf32>
      tpu.vector_store %arg7[%c0_29, %c0_30, %c0_31], %29 {strides = array<i32>} : memref<3x1x256xf32, #tpu.memory_space<vmem>>, vector<3x1x256xf32>,
    } else {
    }
    %c0 = arith.constant 0 : index
    %c0_1 = arith.constant 0 : index
    %c0_2 = arith.constant 0 : index
    %c0_3 = arith.constant 0 : index
    %3 = vector.load %arg2[%c0, %c0_1, %c0_2, %c0_3] : memref<2x1x1x256xf32, #tpu.memory_space<vmem>>, vector<2x1x1x256xf32>
    %c0_4 = arith.constant 0 : index
    %c0_5 = arith.constant 0 : index
    %c0_6 = arith.constant 0 : index
    %c0_7 = arith.constant 0 : index
    %4 = vector.load %arg3[%c0_4, %c0_5, %c0_6, %c0_7] : memref<2x1x1x256xf32, #tpu.memory_space<vmem>>, vector<2x1x1x256xf32>
    %c0_8 = arith.constant 0 : index
    %c0_9 = arith.constant 0 : index
    %c0_10 = arith.constant 0 : index
    %c0_11 = arith.constant 0 : index
    %5 = vector.load %arg4[%c0_8, %c0_9, %c0_10, %c0_11] : memref<2x1x1x256xf32, #tpu.memory_space<vmem>>, vector<2x1x1x256xf32>
    %cst = arith.constant 1.000000e+00 : f32
    %6 = vector.broadcast %cst : f32 to vector<2x1x1x256xf32>
    %7 = arith.mulf %6, %5 : vector<2x1x1x256xf32>
    %c0_12 = arith.constant 0 : index
    %c0_13 = arith.constant 0 : index
    %c0_14 = arith.constant 0 : index
    %c0_15 = arith.constant 0 : index
    %8 = vector.load %arg5[%c0_12, %c0_13, %c0_14, %c0_15] : memref<2x1x1x256xf32, #tpu.memory_space<vmem>>, vector<2x1x1x256xf32>
    %cst_16 = arith.constant 1.000000e+00 : f32
    %9 = vector.broadcast %cst_16 : f32 to vector<2x1x1x256xf32>
    %10 = arith.mulf %9, %8 : vector<2x1x1x256xf32>
    %11 = arith.subf %7, %3 : vector<2x1x1x256xf32>
    %12 = arith.mulf %11, %11 : vector<2x1x1x256xf32>
    %cst_17 = arith.constant dense<0.000000e+00> : vector<1x256xf32>
    %13 = vector.multi_reduction <add>, %12, %cst_17 [0, 1] : vector<2x1x1x256xf32> to vector<1x256xf32>
    %cst_18 = arith.constant dense<0.000000e+00> : vector<1x256xf32>
    %14 = vector.multi_reduction <add>, %3, %cst_18 [0, 1] : vector<2x1x1x256xf32> to vector<1x256xf32>
    %15 = arith.mulf %4, %3 : vector<2x1x1x256xf32>
    %16 = arith.subf %10, %7 : vector<2x1x1x256xf32>
    %17 = arith.mulf %15, %16 : vector<2x1x1x256xf32>
    %cst_19 = arith.constant dense<0.000000e+00> : vector<1x256xf32>
    %18 = vector.multi_reduction <add>, %17, %cst_19 [0, 1] : vector<2x1x1x256xf32> to vector<1x256xf32>
    %19 = vector.shape_cast %13 : vector<1x256xf32> to vector<1x1x256xf32>
    %20 = vector.shape_cast %14 : vector<1x256xf32> to vector<1x1x256xf32>
    %21 = vector.shape_cast %18 : vector<1x256xf32> to vector<1x1x256xf32>
    %22 = tpu.concatenate %19, %20, %21 in 0 : vector<1x1x256xf32>, vector<1x1x256xf32>, vector<1x1x256xf32> -> vector<3x1x256xf32>
    %c0_20 = arith.constant 0 : index
    %c0_21 = arith.constant 0 : index
    %c0_22 = arith.constant 0 : index
    %23 = vector.load %arg7[%c0_20, %c0_21, %c0_22] : memref<3x1x256xf32, #tpu.memory_space<vmem>>, vector<3x1x256xf32>
    %24 = arith.addf %23, %22 : vector<3x1x256xf32>
    %c0_23 = arith.constant 0 : index
    %c0_24 = arith.constant 0 : index
    %c0_25 = arith.constant 0 : index
    %25 = vector.load %arg7[%c0_23, %c0_24, %c0_25] : memref<3x1x256xf32, #tpu.memory_space<vmem>>, vector<3x1x256xf32>
    tpu.vector_store %arg7[%c0_23, %c0_24, %c0_25], %24 {strides = array<i32>} : memref<3x1x256xf32, #tpu.memory_space<vmem>>, vector<3x1x256xf32>,
    %c0_i32_26 = arith.constant 0 : i32
    %26 = arith.cmpi eq, %arg1, %c0_i32_26 : i32
    %27 = arith.extui %26 : i1 to i32
    %c0_i32_27 = arith.constant 0 : i32
    %28 = arith.cmpi ne, %27, %c0_i32_27 : i32
    scf.if %28 {
      %c0_28 = arith.constant 0 : index
      %c0_29 = arith.constant 0 : index
      %c0_30 = arith.constant 0 : index
      %29 = vector.load %arg7[%c0_28, %c0_29, %c0_30] : memref<3x1x256xf32, #tpu.memory_space<vmem>>, vector<1x1x256xf32>
      %30 = vector.shape_cast %29 : vector<1x1x256xf32> to vector<1x256xf32>
      %31 = vector.shape_cast %30 : vector<1x256xf32> to vector<1x1x256xf32>
      %cst_31 = arith.constant dense<0.000000e+00> : vector<1xf32>
      %32 = vector.multi_reduction <add>, %31, %cst_31 [1, 2] : vector<1x1x256xf32> to vector<1xf32>
      %33 = vector.shape_cast %32 : vector<1xf32> to vector<1x1x1xf32>
      %34 = vector.extract %33[0, 0, 0] : f32 from vector<1x1x1xf32>
      %35 = vector.broadcast %34 : f32 to vector<1x1xf32>
      %c1 = arith.constant 1 : index
      %c0_32 = arith.constant 0 : index
      %c0_33 = arith.constant 0 : index
      %36 = vector.load %arg7[%c1, %c0_32, %c0_33] : memref<3x1x256xf32, #tpu.memory_space<vmem>>, vector<1x1x256xf32>
      %37 = vector.shape_cast %36 : vector<1x1x256xf32> to vector<1x256xf32>
      %38 = vector.shape_cast %37 : vector<1x256xf32> to vector<1x1x256xf32>
      %cst_34 = arith.constant dense<0.000000e+00> : vector<1xf32>
      %39 = vector.multi_reduction <add>, %38, %cst_34 [1, 2] : vector<1x1x256xf32> to vector<1xf32>
      %40 = vector.shape_cast %39 : vector<1xf32> to vector<1x1x1xf32>
      %41 = vector.extract %40[0, 0, 0] : f32 from vector<1x1x1xf32>
      %42 = vector.broadcast %41 : f32 to vector<1x1xf32>
      %c2 = arith.constant 2 : index
      %c0_35 = arith.constant 0 : index
      %c0_36 = arith.constant 0 : index
      %43 = vector.load %arg7[%c2, %c0_35, %c0_36] : memref<3x1x256xf32, #tpu.memory_space<vmem>>, vector<1x1x256xf32>
      %44 = vector.shape_cast %43 : vector<1x1x256xf32> to vector<1x256xf32>
      %45 = vector.shape_cast %44 : vector<1x256xf32> to vector<1x1x256xf32>
      %cst_37 = arith.constant dense<0.000000e+00> : vector<1xf32>
      %46 = vector.multi_reduction <add>, %45, %cst_37 [1, 2] : vector<1x1x256xf32> to vector<1xf32>
      %47 = vector.shape_cast %46 : vector<1xf32> to vector<1x1x1xf32>
      %48 = vector.extract %47[0, 0, 0] : f32 from vector<1x1x1xf32>
      %49 = vector.broadcast %48 : f32 to vector<1x1xf32>
      %cst_38 = arith.constant 1.000000e-01 : f32
      %50 = vector.broadcast %cst_38 : f32 to vector<1x1xf32>
      %51 = arith.mulf %50, %42 : vector<1x1xf32>
      %52 = arith.subf %35, %51 : vector<1x1xf32>
      %cst_39 = arith.constant 2.000000e+02 : f32
      %53 = vector.broadcast %cst_39 : f32 to vector<1x1xf32>
      %54 = arith.mulf %53, %49 : vector<1x1xf32>
      %55 = arith.addf %52, %54 : vector<1x1xf32>
      %cst_40 = arith.constant 0.001953125 : f32
      %56 = vector.broadcast %cst_40 : f32 to vector<1x1xf32>
      %57 = arith.mulf %55, %56 : vector<1x1xf32>
      %c0_41 = arith.constant 0 : index
      %c0_42 = arith.constant 0 : index
      %c0_43 = arith.constant 0 : index
      %58 = vector.load %arg6[%c0_41, %c0_42, %c0_43] : memref<1x1x1xf32, #tpu.memory_space<vmem>>, vector<1x1x1xf32>
      %59 = vector.shape_cast %58 : vector<1x1x1xf32> to vector<1x1xf32>
      %60 = vector.shape_cast %57 : vector<1x1xf32> to vector<1x1x1xf32>
      tpu.vector_store %arg6[%c0_41, %c0_42, %c0_43], %60 {strides = array<i32>} : memref<1x1x1xf32, #tpu.memory_space<vmem>>, vector<1x1x1xf32>,
    } else {
    }
    return
  }
  func.func @transform_0(%arg0: i32, %arg1: i32) -> (i32, i32, i32, i32) {
    %c1_i32 = arith.constant 1 : i32
    %0 = arith.muli %arg0, %c1_i32 : i32
    %1 = arith.addi %0, %arg1 : i32
    %c0_i32 = arith.constant 0 : i32
    %c0_i32_0 = arith.constant 0 : i32
    %c0_i32_1 = arith.constant 0 : i32
    %c0_i32_2 = arith.constant 0 : i32
    return %c0_i32, %c0_i32_0, %1, %c0_i32_1 : i32, i32, i32, i32
  }
  func.func @transform_1(%arg0: i32, %arg1: i32) -> (i32, i32, i32, i32) {
    %c1_i32 = arith.constant 1 : i32
    %0 = arith.muli %arg0, %c1_i32 : i32
    %1 = arith.addi %0, %arg1 : i32
    %c0_i32 = arith.constant 0 : i32
    %c0_i32_0 = arith.constant 0 : i32
    %c0_i32_1 = arith.constant 0 : i32
    %c0_i32_2 = arith.constant 0 : i32
    return %c0_i32, %c0_i32_0, %1, %c0_i32_1 : i32, i32, i32, i32
  }
  func.func @transform_2(%arg0: i32, %arg1: i32) -> (i32, i32, i32, i32) {
    %c1_i32 = arith.constant 1 : i32
    %0 = arith.muli %arg0, %c1_i32 : i32
    %1 = arith.addi %0, %arg1 : i32
    %c0_i32 = arith.constant 0 : i32
    %c0_i32_0 = arith.constant 0 : i32
    %c0_i32_1 = arith.constant 0 : i32
    %c0_i32_2 = arith.constant 0 : i32
    return %c0_i32, %c0_i32_0, %1, %c0_i32_1 : i32, i32, i32, i32
  }
  func.func @transform_3(%arg0: i32, %arg1: i32) -> (i32, i32, i32, i32) {
    %c1_i32 = arith.constant 1 : i32
    %0 = arith.muli %arg0, %c1_i32 : i32
    %1 = arith.addi %0, %arg1 : i32
    %c0_i32 = arith.constant 0 : i32
    %c0_i32_0 = arith.constant 0 : i32
    %c0_i32_1 = arith.constant 0 : i32
    %c0_i32_2 = arith.constant 0 : i32
    return %c0_i32, %c0_i32_0, %1, %c0_i32_1 : i32, i32, i32, i32
  }
  func.func @transform_4(%arg0: i32, %arg1: i32) -> (i32, i32, i32) {
    %c0_i32 = arith.constant 0 : i32
    %c0_i32_0 = arith.constant 0 : i32
    %c0_i32_1 = arith.constant 0 : i32
    return %arg0, %c0_i32, %c0_i32_0 : i32, i32, i32
  }
}

</mosaic_0001>

<bundles_post_ra>
// kernel: tpu_custom_call.1
= control target key start
LH: loop header
LB: loop body
LE: loop exit
PB: predicated region body
PF: predicated region fallthrough
CT: control target
= control target key end

     0   :  { %9 = vsyncpa [#allocation4], 0  ;;  %s687_s0 = inlined_call_operand.hbm [shape: f32[2,5,1,256], index: 0, kind: input, shape index: {}]   ;;  %s688_s1 = inlined_call_operand.hbm [shape: f32[2,5,1,256], index: 1, kind: input, shape index: {}]   ;;  %s689_s2 = inlined_call_operand.hbm [shape: f32[2,5,1,256], index: 2, kind: input, shape index: {}]   ;;  %s690_s3 = inlined_call_operand.hbm [shape: f32[2,5,1,256], index: 3, kind: input, shape index: {}]   ;;  %s691_s4 = inlined_call_operand.hbm [shape: f32[1,1,1], index: 4, kind: output, shape index: {}]  }
   0x1   :  { %10 = vsyncpa [#allocation7], 0 }
   0x2   :  { %11 = vsyncpa [#allocation10], 0 }
   0x3   :  { %12 = vsyncpa [#allocation5], 0  ;;  %s512_s15 = smov [#allocation6]   ;;  %s513_s17 = smov [#allocation3]  }
   0x4   :  { %s38_s16 = sshll.u32 %s512_s15, 4  ;;  %s22_s18 = sshll.u32 %s513_s17, 4  ;;  %s39_s16 = int_to_ptr.vmem [resolvable:$true] %s38_s16  ;;  %s23_s18 = int_to_ptr.vmem [resolvable:$true] %s22_s18 }
   0x5   :  { %s394_s21 = scalar_lea.hbm %s688_s1, 64  ;;  %s396_s26 = scalar_lea.hbm %s688_s1, 320 }
   0x6   :  { %p395_p0 = scmp.ne.s32.totalorder %s688_s1, %s394_s21  ;;  %p397_p1 = scmp.lt.u32.totalorder %s396_s26, %s394_s21 }
   0x7   :  { %p398_p2 = scmp.lt.u32.totalorder %s394_s21, %s688_s1 }
   0x9   :  { %p399_p3 = por %p398_p2, %p397_p1 }
   0xb   :  { %p400_p4 = pnand %p399_p3, %p395_p0 }
   0xd   :  { %403 = shalt.err (!%p400_p4)
}
   0xe   :  { %s404_s29 = scalar_lea.vmem %s39_s16, 64  ;;  %p409_p6 = scmp.lt.s32.totalorder %s39_s16, %s39_s16 }
   0xf   :  { %p405_p5 = scmp.ne.s32.totalorder %s39_s16, %s404_s29  ;;  %p410_p7 = scmp.lt.s32.totalorder %s404_s29, %s404_s29 }
  0x11   :  { %p411_p8 = por %p410_p7, %p409_p6 }
  0x13   :  { %p412_p9 = pnand %p411_p8, %p405_p5 }
  0x15   :  { %415 = shalt.err (!%p412_p9)
}
  0x16   :  { %s514_s30 = smov 160   ;;  %s515_s5 = smov 32  }
  0x17   :  { %s516_s6 = smov 2   ;;  %s416_s11 = scalar_lea.hbm %s687_s0, 64 }
  0x18   :  { %44 = dma.hbm_to_vmem [thread:$0]  %s688_s1, 64, %s39_s16, [#allocation7], %s514_s30, %s515_s5, %s516_s6  }
  0x19   :  { %p417_p10 = scmp.ne.s32.totalorder %s687_s0, %s416_s11  ;;  %s418_s17 = scalar_lea.hbm %s687_s0, 320 }
  0x1a   :  { %p419_p11 = scmp.lt.u32.totalorder %s418_s17, %s416_s11  ;;  %p420_p12 = scmp.lt.u32.totalorder %s416_s11, %s687_s0 }
  0x1c   :  { %p421_p13 = por %p420_p12, %p419_p11 }
  0x1e   :  { %p422_p0 = pnand %p421_p13, %p417_p10 }
  0x20   :  { %425 = shalt.err (!%p422_p0)
}
  0x21   :  { %s426_s1 = scalar_lea.vmem %s23_s18, 64  ;;  %p431_p2 = scmp.lt.s32.totalorder %s23_s18, %s23_s18 }
  0x22   :  { %p427_p1 = scmp.ne.s32.totalorder %s23_s18, %s426_s1  ;;  %p432_p3 = scmp.lt.s32.totalorder %s426_s1, %s426_s1 }
  0x24   :  { %p433_p4 = por %p432_p3, %p431_p2 }
  0x26   :  { %p434_p5 = pnand %p433_p4, %p427_p1 }
  0x28   :  { %437 = shalt.err (!%p434_p5)
}
  0x29   :  { %28 = dma.hbm_to_vmem [thread:$0]  %s687_s0, 64, %s23_s18, [#allocation4], %s514_s30, %s515_s5, %s516_s6  }
  0x2a   :  { %s517_s22 = smov [#allocation8]   ;;  %s518_s24 = smov [#allocation9]  }
  0x2b   :  { %s54_s23 = sshll.u32 %s517_s22, 4  ;;  %s70_s25 = sshll.u32 %s518_s24, 4  ;;  %s55_s23 = int_to_ptr.vmem [resolvable:$true] %s54_s23  ;;  %s71_s25 = int_to_ptr.vmem [resolvable:$true] %s70_s25 }
  0x2c   :  { %s438_s28 = scalar_lea.hbm %s689_s2, 64  ;;  %s440_s10 = scalar_lea.hbm %s689_s2, 320 }
  0x2d   :  { %p439_p6 = scmp.ne.s32.totalorder %s689_s2, %s438_s28  ;;  %p441_p7 = scmp.lt.u32.totalorder %s440_s10, %s438_s28 }
  0x2e   :  { %p442_p8 = scmp.lt.u32.totalorder %s438_s28, %s689_s2 }
  0x30   :  { %p443_p9 = por %p442_p8, %p441_p7 }
  0x32   :  { %p444_p10 = pnand %p443_p9, %p439_p6 }
  0x34   :  { %447 = shalt.err (!%p444_p10)
}
  0x35   :  { %s448_s18 = scalar_lea.vmem %s55_s23, 64  ;;  %p453_p12 = scmp.lt.s32.totalorder %s55_s23, %s55_s23 }
  0x36   :  { %p449_p11 = scmp.ne.s32.totalorder %s55_s23, %s448_s18  ;;  %p454_p13 = scmp.lt.s32.totalorder %s448_s18, %s448_s18 }
  0x38   :  { %p455_p0 = por %p454_p13, %p453_p12 }
  0x3a   :  { %p456_p1 = pnand %p455_p0, %p449_p11 }
  0x3c   :  { %459 = shalt.err (!%p456_p1)
}
  0x3d   :  { %60 = dma.hbm_to_vmem [thread:$0]  %s689_s2, 64, %s55_s23, [#allocation7], %s514_s30, %s515_s5, %s516_s6  }
  0x3e   :  { %s460_s17 = scalar_lea.hbm %s690_s3, 64  ;;  %s462_s21 = scalar_lea.hbm %s690_s3, 320 }
  0x3f   :  { %p461_p2 = scmp.ne.s32.totalorder %s690_s3, %s460_s17  ;;  %p463_p3 = scmp.lt.u32.totalorder %s462_s21, %s460_s17 }
  0x40   :  { %p464_p4 = scmp.lt.u32.totalorder %s460_s17, %s690_s3 }
  0x42   :  { %p465_p5 = por %p464_p4, %p463_p3 }
  0x44   :  { %p466_p6 = pnand %p465_p5, %p461_p2 }
  0x46   :  { %469 = shalt.err (!%p466_p6)
}
  0x47   :  { %s470_s2 = scalar_lea.vmem %s71_s25, 64  ;;  %p475_p8 = scmp.lt.s32.totalorder %s71_s25, %s71_s25 }
  0x48   :  { %p471_p7 = scmp.ne.s32.totalorder %s71_s25, %s470_s2  ;;  %p476_p9 = scmp.lt.s32.totalorder %s470_s2, %s470_s2 }
  0x4a   :  { %p477_p10 = por %p476_p9, %p475_p8 }
  0x4c   :  { %p478_p11 = pnand %p477_p10, %p471_p7 }
  0x4e   :  { %481 = shalt.err (!%p478_p11)
}
  0x4f   :  { %76 = dma.hbm_to_vmem [thread:$0]  %s690_s3, 64, %s71_s25, [#allocation10], %s514_s30, %s515_s5, %s516_s6  }
  0x50   :  { %504 = dma.done.wait [#allocation4], 64  }
  0x51   :  { %505 = vsyncadd [#allocation4], 4294967232 }
  0x52   :  { %506 = dma.done.wait [#allocation7], 128  }
  0x53   :  { %507 = vsyncadd [#allocation7], 4294967168 }
  0x54   :  { %508 = dma.done.wait [#allocation10], 64  }
  0x55   :  { %509 = vsyncadd [#allocation10], 4294967232  ;;  %v97_v0 = vlaneseq  ;;  %v519_v3 = vmov 0.0   ;;  %v520_v4 = vmov 1966171168   ;;  %vm138_vm1 = vcmask 1040384  }
  0x56   :  { %v218_v5 = vunpack.c.l.s4 %v520_v4  ;;  %v104_v8 = vld [vmem:[#allocation3] sm:$0x3]  ;;  %v105_v9 = vld [vmem:[#allocation3 + $0x2] sm:$0x3]  ;;  %v106_v10 = vld [vmem:[#allocation6] sm:$0x3] }
  0x57   :  { %vm619_vm0 = vcmp.lt.s32.totalorder %v97_v0, 256  ;;  %v119_v2 = vshrl.u32 %v97_v0, 7  ;;  %v107_v12 = vld [vmem:[#allocation6 + $0x2] sm:$0x3]  ;;  %v108_v13 = vld [vmem:[#allocation8] sm:$0x3]  ;;  %v173_v15 = vmul.f32 %v106_v10, %v104_v8 }
  0x58   :  { %103 = vst.msk [vmem:[#allocation2 + $0x4] sm:$0x3] %vm619_vm0, %v519_v3  ;;  %101 = vst.msk [vmem:[#allocation2] sm:$0x3] %vm619_vm0, %v519_v3  ;;  %v219_v11 = vunpack.c.0.s8 %v218_v5  ;;  %v109_v14 = vld [vmem:[#allocation8 + $0x2] sm:$0x3]  ;;  %v174_v21 = vmul.f32 %v107_v12, %v105_v9  ;;  %v112_v22 = vsub.f32 %v108_v13, %v104_v8 }
  0x59   :  { %102 = vst.msk [vmem:[#allocation2 + $0x2] sm:$0x3] %vm619_vm0, %v519_v3  ;;  %v629_v6 = vsub.s32 0, %v119_v2  ;;  %v631_v7 = vsub.s32 1, %v119_v2  ;;  %v110_v19 = vld [vmem:[#allocation9] sm:$0x3]  ;;  %v113_v23 = vsub.f32 %v109_v14, %v105_v9 }
  0x5a   :  { %v111_v20 = vld [vmem:[#allocation9 + $0x2] sm:$0x3]  ;;  %v175_v25 = vsub.f32 %v110_v19, %v108_v13  ;;  %v222_v29 = vsub.s32 %v219_v11, %v119_v2  ;;  %v114_v30 = vmul.f32 %v112_v22, %v112_v22  ;;  %s521_s6 = smov [#allocation11]   ;;  %vm359_vm2 = vcmask 0  }
  0x5b   :  { %v150_v16 = vrot.slane %v104_v8, %v629_v6  ;;  %v154_v17 = vrot.slane %v104_v8, %v631_v7  ;;  %v158_v18 = vrot.slane %v105_v9, %v629_v6  ;;  %v162_v24 = vrot.slane %v105_v9, %v631_v7  ;;  %s367_s25 = sshll.u32 %s521_s6, 4  ;;  %s368_s25 = int_to_ptr.vmem [resolvable:$true] %s367_s25 }
  0x5c   :  { %v176_v26 = vsub.f32 %v111_v20, %v109_v14  ;;  %v115_v31 = vmul.f32 %v113_v23, %v113_v23  ;;  %v177_v33 = vmul.f32 %v175_v25, %v173_v15  ;;  %v121_v37 = vrot.slane %v114_v30, %v629_v6  ;;  %s482_s27 = scalar_lea.vmem %s368_s25, 16  ;;  %s486_s28 = scalar_lea.vmem %s368_s25, 32 }
  0x5d   :  { %v167_v27 = vsel %vm138_vm1, %v150_v16, 0.0  ;;  %v168_v28 = vsel %vm138_vm1, %v158_v18, 0.0  ;;  %v170_v35 = vsel %vm138_vm1, %v154_v17, 0.0  ;;  %v171_v36 = vsel %vm138_vm1, %v162_v24, 0.0  ;;  %p483_p12 = scmp.ne.s32.totalorder %s368_s25, %s482_s27  ;;  %p487_p13 = scmp.lt.s32.totalorder %s368_s25, %s368_s25 }
  0x5e   :  { %v169_v32 = vadd.f32 %v168_v28, %v167_v27  ;;  %v178_v34 = vmul.f32 %v176_v26, %v174_v21  ;;  %v125_v38 = vrot.slane %v114_v30, %v631_v7  ;;  %v129_v39 = vrot.slane %v115_v31, %v629_v6  ;;  %p488_p0 = scmp.lt.s32.totalorder %s486_s28, %s482_s27 }
  0x5f   :  { %v133_v40 = vrot.slane %v115_v31, %v631_v7  ;;  %v184_v41 = vrot.slane %v177_v33, %v629_v6  ;;  %v188_v42 = vrot.slane %v177_v33, %v631_v7  ;;  %v139_v45 = vsel %vm138_vm1, %v121_v37, 0.0  ;;  %v209_v63 = vld [vmem:[#allocation2 + $0x4] sm:$0x3]  ;;  %v207_v0 = vld [vmem:[#allocation2] sm:$0x3] }
  0x60   :  { %v192_v43 = vrot.slane %v178_v34, %v629_v6  ;;  %v196_v44 = vrot.slane %v178_v34, %v631_v7  ;;  %v140_v46 = vsel %vm138_vm1, %v129_v39, 0.0  ;;  %v142_v47 = vsel %vm138_vm1, %v125_v38, 0.0  ;;  %v208_v5 = vld [vmem:[#allocation2 + $0x2] sm:$0x3]  ;;  %p489_p1 = por %p488_p0, %p487_p13 }
  0x61   :  { %v143_v48 = vsel %vm138_vm1, %v133_v40, 0.0  ;;  %v201_v49 = vsel %vm138_vm1, %v184_v41, 0.0  ;;  %v204_v51 = vsel %vm138_vm1, %v188_v42, 0.0  ;;  %v141_v55 = vadd.f32 %v140_v46, %v139_v45 }
  0x62   :  { %v202_v50 = vsel %vm138_vm1, %v192_v43, 0.0  ;;  %v205_v52 = vsel %vm138_vm1, %v196_v44, 0.0  ;;  %v144_v56 = vadd.f32 %v143_v48, %v142_v47  ;;  %v172_v57 = vadd.f32 %v171_v36, %v170_v35  ;;  %p490_p2 = pnand %p489_p1, %p483_p12 }
  0x63   :  { %v203_v53 = vadd.f32 %v202_v50, %v201_v49  ;;  %v206_v54 = vadd.f32 %v205_v52, %v204_v51 }
  0x64   :  { %v216_v59 = vcombine.low %v141_v55, %v144_v56  ;;  %v231_v60 = vcombine.low %v169_v32, %v172_v57 }
  0x65   :  { %v246_v58 = vcombine.low %v203_v53, %v206_v54 }
  0x66   :  { %v223_v62 = vrot.slane %v216_v59, %v222_v29  ;;  %v238_v2 = vrot.slane %v231_v60, %v222_v29 }
  0x67   :  { %v253_v61 = vrot.slane %v246_v58, %v222_v29 }
  0x68   :  { %v230_v4 = vrot.slane %v223_v62, %v222_v29  ;;  %v245_v8 = vrot.slane %v238_v2, %v222_v29 }
  0x69   :  { %v260_v3 = vrot.slane %v253_v61, %v222_v29 }
  0x6a   :  { %v264_v10 = vadd.f32 %v230_v4, %v207_v0  ;;  %v265_v11 = vadd.f32 %v245_v8, %v208_v5 }
  0x6b   :  { %v266_v9 = vadd.f32 %v260_v3, %v209_v63 }
  0x6c   :  { %271 = vst.msk [vmem:[#allocation2] sm:$0x3] %vm619_vm0, %v264_v10  ;;  %272 = vst.msk [vmem:[#allocation2 + $0x2] sm:$0x3] %vm619_vm0, %v265_v11 }
  0x6d   :  { %273 = vst.msk [vmem:[#allocation2 + $0x4] sm:$0x3] %vm619_vm0, %v266_v9 }
  0x73   :  { %v277_v13 = vld [vmem:[#allocation2] sm:$0x3]  ;;  %v303_v18 = vld [vmem:[#allocation2 + $0x2] sm:$0x3] }
  0x74   :  { %v329_v12 = vld [vmem:[#allocation2 + $0x4] sm:$0x3]  ;;  %v282_v16 = vrot.slane %v277_v13, %v629_v6  ;;  %v286_v17 = vrot.slane %v277_v13, %v631_v7  ;;  %v308_v19 = vrot.slane %v303_v18, %v629_v6  ;;  %v312_v20 = vrot.slane %v303_v18, %v631_v7 }
  0x75   :  { %v334_v14 = vrot.slane %v329_v12, %v629_v6  ;;  %v338_v15 = vrot.slane %v329_v12, %v631_v7 }
  0x76   :  { %v289_v22 = vsel %vm138_vm1, %v282_v16, 0.0  ;;  %v290_v23 = vsel %vm138_vm1, %v286_v17, 0.0  ;;  %v315_v26 = vsel %vm138_vm1, %v308_v19, 0.0  ;;  %v316_v27 = vsel %vm138_vm1, %v312_v20, 0.0 }
  0x77   :  { %v341_v21 = vsel %vm138_vm1, %v334_v14, 0.0  ;;  %v342_v1 = vsel %vm138_vm1, %v338_v15, 0.0  ;;  %v291_v25 = vadd.f32 %v290_v23, %v289_v22  ;;  %v317_v28 = vadd.f32 %v316_v27, %v315_v26 }
  0x78   :  { %v343_v24 = vadd.f32 %v342_v1, %v341_v21 }
  0x79   :  { %292 = vadd.xlane.f32.xlu0 %v291_v25 }
  0x7a   :  { %344 = vadd.xlane.f32.xlu1 %v343_v24 }
  0x7d   :  { %318 = vadd.xlane.f32.xlu0 %v317_v28 }
 0x106   :  { %v293_v7 = vpop.xlane.xlu0 %292 }
 0x107   :  { %v345_v6 = vpop.xlane.xlu1 %344  ;;  %v294_v30 = vrot.slane %v293_v7, 4 }
 0x108   :  { %v346_v29 = vrot.slane %v345_v6, 4 }
 0x109   :  { %v295_v32 = vadd.f32 %v294_v30, %v293_v7 }
 0x10a   :  { %v347_v31 = vadd.f32 %v346_v29, %v345_v6  ;;  %v319_v33 = vpop.xlane.xlu0 %318 }
 0x10b   :  { %v296_v35 = vrot.slane %v295_v32, 2  ;;  %v320_v36 = vrot.slane %v319_v33, 4 }
 0x10c   :  { %v348_v34 = vrot.slane %v347_v31, 2 }
 0x10d   :  { %v321_v37 = vadd.f32 %v320_v36, %v319_v33  ;;  %v297_v38 = vadd.f32 %v296_v35, %v295_v32 }
 0x10e   :  { %v349_v39 = vadd.f32 %v348_v34, %v347_v31 }
 0x10f   :  { %v322_v40 = vrot.slane %v321_v37, 2  ;;  %v298_v41 = vrot.slane %v297_v38, 1 }
 0x110   :  { %v350_v44 = vrot.slane %v349_v39, 1 }
 0x111   :  { %v323_v42 = vadd.f32 %v322_v40, %v321_v37  ;;  %v299_v43 = vadd.f32 %v298_v41, %v297_v38 }
 0x112   :  { %v351_v47 = vadd.f32 %v350_v44, %v349_v39 }
 0x113   :  { %378 = vpush %v299_v43  ;;  %v324_v45 = vrot.slane %v323_v42, 1 }
 0x115   :  { %v325_v46 = vadd.f32 %v324_v45, %v323_v42 }
 0x117   :  { %380 = vpush %v325_v46 }
 0x118   :  { %382 = vpush %v351_v47 }
 0x144   :  { %s379_s3 = spop %378 }
 0x145   :  { %v301_v51 = vstv %s379_s3 }
 0x148   :  { %s381_s30 = spop %380 }
 0x149   :  { %v327_v48 = vstv %s381_s30  ;;  %s383_s5 = spop %382 }
 0x14a   :  { %v354_v49 = vmul.f32 0.1, %v327_v48  ;;  %v353_v50 = vstv %s383_s5 }
 0x14b   :  { %v356_v53 = vmul.f32 200.0, %v353_v50 }
 0x14c   :  { %v355_v52 = vsub.f32 %v301_v51, %v354_v49 }
 0x14e   :  { %v357_v54 = vadd.f32 %v356_v53, %v355_v52 }
 0x150   :  { %v358_v55 = vmul.f32 0.001953125, %v357_v54 }
 0x152   :  { %360 = vst.msk [vmem:[#allocation11] sm:$0x1] %vm359_vm2, %v358_v55 }
 0x153   :  { %493 = shalt.err (!%p490_p2)
}
 0x154   :  { %s494_s8 = scalar_lea.hbm %s691_s4, 16 }
 0x155   :  { %p495_p3 = scmp.ne.s32.totalorder %s691_s4, %s494_s8  ;;  %p498_p4 = scmp.lt.u32.totalorder %s494_s8, %s691_s4 }
 0x157   :  { %p500_p5 = pnand %p498_p4, %p495_p3 }
 0x159   :  { %503 = shalt.err (!%p500_p5)
}
 0x15a   :  { %370 = dma.vmem_to_hbm [thread:$0]  %s368_s25, 16, %s691_s4, [#allocation5]  }
 0x15b   :  { %510 = dma.done.wait [#allocation5], 16  }
 0x15c   :  { %511 = vsyncadd [#allocation5], 4294967280 }
 0x15d   :  { %374 = vsyncpa [#allocation4], 1 }
 0x15e   :  { %375 = vsyncpa [#allocation7], 1 }
 0x15f   :  { %376 = vsyncpa [#allocation10], 1 }
 0x160   :  { %377 = vsyncpa [#allocation5], 1 }

</bundles_post_ra>
